<compile_context>
chip_gen: v7x
topology: tpu7x:2x2x1
jax: 0.10.0
libtpu: 0.0.40
codegen_flags: <defaults>
</compile_context>

<pallas_src>
import math

import jax
import jax.numpy as jnp
from jax.experimental import pallas as pl
from jax.experimental.pallas import tpu as pltpu


# --------------------------- budgets & tiling ------------------------------ #

def _derive_vmem_limit():
    """Scoped-VMEM budget derived from the chip (~96MiB v5e/v6e, ~48MiB v7x)."""
    try:
        info = pltpu.get_tpu_info()
        cap = int(getattr(info, "vmem_capacity_bytes", 0) or 0)
    except Exception:
        cap = 0
    if cap <= 0:
        cap = 64 * 1024 * 1024
    return int(min(cap * 3 // 4, 96 * 1024 * 1024))


_VMEM_LIMIT = _derive_vmem_limit()


def _pick_batch_tile(batch, bytes_per_item=0, cap=8):
    """Largest divisor of `batch` <= cap that also fits ~1/4 of the VMEM budget."""
    if bytes_per_item:
        cap = max(1, min(cap, (_VMEM_LIMIT // 4) // max(bytes_per_item, 1)))
    for bt in range(min(batch, cap), 0, -1):
        if batch % bt == 0:
            return bt
    return 1


def _mlp_reduction_tile(din, max_tk=2048, align=256):
    """(tile, n_steps): 256-aligned reduction tile; din is zero-padded to tile*n_steps."""
    n_steps = max(1, -(-din // max_tk))
    tk = -(-din // n_steps)
    tk = -(-tk // align) * align
    return tk, n_steps


# ------------------------------- kernels ----------------------------------- #

def _mts_emb_kernel(tp_ref, mask_ref, data_ref, freq_ref, phase_ref,
                    wt_ref, bt_ref, ff_ref, wx_ref, out_ref):
    """Fused get_mts_emb for Bt batch elements (grid over B // Bt).

    mts_emb is stored as (B, C, K*L) bf16 so stores are lane-dense even for
    small L.  out[b, c, k*L + l] == torch mts_emb[b, c, k, l].
    """
    two_ch = wt_ref.shape[0]
    bt_sz = mask_ref.shape[0]
    kl = mask_ref.shape[2]
    l_sz = tp_ref.shape[2] // bt_sz
    k_sz = kl // l_sz

    x_co = mask_ref[...] * data_ref[...]                          # (Bt, 1, K*L)

    # Sinusoidal time embedding for all Bt elements stacked on the lane axis,
    # then one (2ch, timeemb) x (timeemb, Bt*L) MXU matmul (bf16 in, f32 acc).
    pe = jnp.sin(freq_ref[...] * tp_ref[0] + phase_ref[...])       # (timeemb, Bt*L)
    t_feat = jnp.dot(wt_ref[...], pe.astype(jnp.bfloat16),
                     preferred_element_type=jnp.float32) + bt_ref[...]   # (2ch, Bt*L)

    wx = wx_ref[...]                                               # (2ch, 1)
    ff = ff_ref[...]                                               # (2ch, K*L), batch-invariant
    for b in range(bt_sz):                                         # static unroll, Bt <= 8
        tf_b = jnp.tile(t_feat[:, b * l_sz:(b + 1) * l_sz], (1, k_sz))  # (2ch, K*L)
        cond_b = jnp.tanh(wx * x_co[b] + tf_b + ff)                     # (2ch, K*L)
        out_ref[b, :two_ch, :] = cond_b.astype(out_ref.dtype)
        out_ref[b, two_ch:, :] = mask_ref[b].astype(out_ref.dtype)      # mask channel


def _normalize_kernel(x_ref, out_ref, mean_ref, std_ref):
    """Per-feature time normalization (unbiased=False, eps inside the sqrt)."""
    x = x_ref[...]                                                 # (Bt, K, L)
    mean = jnp.mean(x, axis=-1, keepdims=True)
    xc = x - mean
    var = jnp.mean(xc * xc, axis=-1, keepdims=True)
    std = jnp.sqrt(var + 1e-5)
    out_ref[...] = xc / std
    mean_ref[...] = mean
    std_ref[...] = std


def _mlp_head_kernel(x_ref, w1_ref, b1_ref, w2_ref, b2_ref, w3_ref, b3_ref,
                     o_ref, acc_ref):
    """Classification head; grid axis 0 tiles the (padded) first-layer reduction."""
    k = pl.program_id(0)

    @pl.when(k == 0)
    def _init():
        acc_ref[...] = jnp.zeros_like(acc_ref)

    # x and w1 are both bf16 (activation slab stored bf16, weights pre-cast).
    acc_ref[...] += jnp.dot(x_ref[...], w1_ref[...],
                            preferred_element_type=jnp.float32)

    @pl.when(k == pl.num_programs(0) - 1)
    def _finalize():
        h = acc_ref[...] + b1_ref[...]
        h = h * jax.nn.sigmoid(h)                                  # SiLU
        # TODO(synk): nn.Dropout(0.5) is identity here (eval-mode forward).
        h = jnp.dot(h.astype(jnp.bfloat16), w2_ref[...],
                    preferred_element_type=jnp.float32) + b2_ref[...]
        h = h * jax.nn.sigmoid(h)                                  # SiLU
        o_ref[...] = jnp.dot(h.astype(jnp.bfloat16), w3_ref[...],
                             preferred_element_type=jnp.float32) + b3_ref[...]


def _ad_head_kernel(x_ref, w_ref, b_ref, std_ref, mean_ref, o_ref):
    """Anomaly head: y[k,l] = sum_m W[k,m] x[m,l] + b[k], fused de-normalize."""
    bt_sz = o_ref.shape[0]
    m = w_ref.shape[1]                    # = (C-1)*K; the mask channel is never used
    w = w_ref[...]                        # (K, M) bf16
    bias = b_ref[...]                     # (K, 1) f32
    for b in range(bt_sz):                # static unroll, Bt <= 8
        xb = x_ref[b][:m]                 # (M, L) bf16
        y = jnp.dot(w, xb, preferred_element_type=jnp.float32) + bias   # (K, L)
        o_ref[b] = y * std_ref[b] + mean_ref[b]


def _diff_loss_kernel(sa_ref, sb_ref, obs_ref, noise_ref, pred_ref, cond_ref,
                      obsm_ref, noisy_ref, sumsq_ref, cnt_ref):
    """calc_loss core for Bt batch elements; per-block partial sums (no serial dep)."""
    obs = obs_ref[...]                                             # (Bt, 1, K*L)
    noise = noise_ref[...]
    noisy = sa_ref[...] * obs + sb_ref[...] * noise
    noisy_ref[...] = (1.0 - cond_ref[...]) * noisy                 # set_input_to_diffmodel
    tmask = obsm_ref[...] - cond_ref[...]
    resid = (noise - pred_ref[...]) * tmask
    sumsq_ref[...] = jnp.sum(resid * resid).reshape(1, 1, 1)
    cnt_ref[...] = jnp.sum(tmask).reshape(1, 1, 1)


# ------------------------------- wrappers ----------------------------------- #

def get_mts_emb(observed_tp, mask, data, emb_params):
    """(B,L) times + (B,K,L) mask/data -> (B, C, K*L) bf16 MTS embedding."""
    freq, phase, wt_bf16, bt, f_feat_kl, wx = emb_params
    B, K, L = data.shape
    two_ch = wt_bf16.shape[0]
    C = two_ch + 1
    KL = K * L

    bytes_per_b = C * KL * 2 + 2 * KL * 4 + L * 4
    Bt = _pick_batch_tile(B, bytes_per_b)
    nblk = B // Bt

    tp = observed_tp.astype(jnp.float32).reshape(nblk, 1, Bt * L)
    mask_kl = mask.astype(jnp.float32).reshape(B, 1, KL)
    data_kl = data.astype(jnp.float32).reshape(B, 1, KL)

    def const_spec(a):                       # whole small array, fetched once
        nd = a.ndim
        return pl.BlockSpec(a.shape, lambda b, _nd=nd: (0,) * _nd)

    return pl.pallas_call(
        _mts_emb_kernel,
        out_shape=jax.ShapeDtypeStruct((B, C, KL), jnp.bfloat16),
        grid=(nblk,),
        in_specs=[
            pl.BlockSpec((1, 1, Bt * L), lambda b: (b, 0, 0)),
            pl.BlockSpec((Bt, 1, KL), lambda b: (b, 0, 0)),
            pl.BlockSpec((Bt, 1, KL), lambda b: (b, 0, 0)),
            const_spec(freq), const_spec(phase), const_spec(wt_bf16),
            const_spec(bt), const_spec(f_feat_kl), const_spec(wx),
        ],
        out_specs=pl.BlockSpec((Bt, C, KL), lambda b: (b, 0, 0)),
        compiler_params=pltpu.CompilerParams(
            dimension_semantics=("parallel",),
            vmem_limit_bytes=_VMEM_LIMIT),
    )(tp, mask_kl, data_kl, freq, phase, wt_bf16, bt, f_feat_kl, wx)


def normalize_for_ad(x):
    """x: (B, K, L) -> (normalized, means (B,K,1), stdev (B,K,1))."""
    B, K, L = x.shape
    Bt = _pick_batch_tile(B)
    blk = pl.BlockSpec((Bt, K, L), lambda b: (b, 0, 0))
    blk1 = pl.BlockSpec((Bt, K, 1), lambda b: (b, 0, 0))
    return pl.pallas_call(
        _normalize_kernel,
        out_shape=(jax.ShapeDtypeStruct((B, K, L), jnp.float32),
                   jax.ShapeDtypeStruct((B, K, 1), jnp.float32),
                   jax.ShapeDtypeStruct((B, K, 1), jnp.float32)),
        grid=(B // Bt,),
        in_specs=[blk],
        out_specs=(blk, blk1, blk1),
        compiler_params=pltpu.CompilerParams(
            dimension_semantics=("parallel",),
            vmem_limit_bytes=_VMEM_LIMIT),
    )(x.astype(jnp.float32))


def mlp_head(x, w1, b1, w2, b2, w3, b3):
    """self.mlp classification head (eval-mode dropout), 256-aligned reduction tiles."""
    n, din = x.shape
    hidden = w1.shape[1]
    ncls = w3.shape[1]
    tk, n_steps = _mlp_reduction_tile(din)
    padded = tk * n_steps
    if padded != din:                              # zero-pad: contributes 0 to the matmul
        x = jnp.pad(x, ((0, 0), (0, padded - din)))
        w1 = jnp.pad(w1, ((0, padded - din), (0, 0)))
    return pl.pallas_call(
        _mlp_head_kernel,
        out_shape=jax.ShapeDtypeStruct((n, ncls), jnp.float32),
        grid=(n_steps,),
        in_specs=[
            pl.BlockSpec((n, tk), lambda k: (0, k)),
            pl.BlockSpec((tk, hidden), lambda k: (k, 0)),
            pl.BlockSpec((1, hidden), lambda k: (0, 0)),
            pl.BlockSpec((hidden, hidden), lambda k: (0, 0)),
            pl.BlockSpec((1, hidden), lambda k: (0, 0)),
            pl.BlockSpec((hidden, ncls), lambda k: (0, 0)),
            pl.BlockSpec((1, ncls), lambda k: (0, 0)),
        ],
        out_specs=pl.BlockSpec((n, ncls), lambda k: (0, 0)),
        scratch_shapes=[pltpu.VMEM((n, hidden), jnp.float32)],
        compiler_params=pltpu.CompilerParams(
            dimension_semantics=("arbitrary",),        # reduction axis
            vmem_limit_bytes=_VMEM_LIMIT),
    )(x, w1, b1.reshape(1, hidden), w2, b2.reshape(1, hidden),
      w3, b3.reshape(1, ncls))


def ad_head(mts_emb, conv_w, conv_b, stdev, means):
    """self.conv anomaly head with fused de-normalization; mask channel never read."""
    B, C, KL = mts_emb.shape
    K, M = conv_w.shape                   # M = (C-1)*K
    L = KL // K
    Bt = _pick_batch_tile(B)
    emb_rows = mts_emb.reshape(B, C * K, L)        # free metadata reshape in JAX
    rows = M if M % 8 == 0 else C * K              # sliced block when layout allows
    return pl.pallas_call(
        _ad_head_kernel,
        out_shape=jax.ShapeDtypeStruct((B, K, L), jnp.float32),
        grid=(B // Bt,),
        in_specs=[
            pl.BlockSpec((Bt, rows, L), lambda b: (b, 0, 0)),
            pl.BlockSpec((K, M), lambda b: (0, 0)),
            pl.BlockSpec((K, 1), lambda b: (0, 0)),
            pl.BlockSpec((Bt, K, 1), lambda b: (b, 0, 0)),
            pl.BlockSpec((Bt, K, 1), lambda b: (b, 0, 0)),
        ],
        out_specs=pl.BlockSpec((Bt, K, L), lambda b: (b, 0, 0)),
        compiler_params=pltpu.CompilerParams(
            dimension_semantics=("parallel",),
            vmem_limit_bytes=_VMEM_LIMIT),
    )(emb_rows, conv_w, conv_b.reshape(K, 1), stdev, means)


def diff_loss_core(observed_data, noise, predicted, cond_mask, observed_mask,
                   current_alpha):
    """calc_loss core: returns (noisy_target (B,K,L), sum_sq_residual, num_eval)."""
    B, K, L = observed_data.shape
    KL = K * L
    Bt = _pick_batch_tile(B)
    nblk = B // Bt
    sa = jnp.sqrt(current_alpha).astype(jnp.float32).reshape(B, 1, 1)
    sb = jnp.sqrt(1.0 - current_alpha).astype(jnp.float32).reshape(B, 1, 1)

    as_kl = lambda a: a.astype(jnp.float32).reshape(B, 1, KL)
    blk_kl = pl.BlockSpec((Bt, 1, KL), lambda b: (b, 0, 0))
    blk_sc = pl.BlockSpec((Bt, 1, 1), lambda b: (b, 0, 0))
    blk_p1 = pl.BlockSpec((1, 1, 1), lambda b: (b, 0, 0))

    noisy, sumsq, cnt = pl.pallas_call(
        _diff_loss_kernel,
        out_shape=(jax.ShapeDtypeStruct((B, 1, KL), jnp.float32),
                   jax.ShapeDtypeStruct((nblk, 1, 1), jnp.float32),
                   jax.ShapeDtypeStruct((nblk, 1, 1), jnp.float32)),
        grid=(nblk,),
        in_specs=[blk_sc, blk_sc, blk_kl, blk_kl, blk_kl, blk_kl, blk_kl],
        out_specs=(blk_kl, blk_p1, blk_p1),
        compiler_params=pltpu.CompilerParams(
            dimension_semantics=("parallel",),         # no cross-step accumulation
            vmem_limit_bytes=_VMEM_LIMIT),
    )(sa, sb, as_kl(observed_data), as_kl(noise), as_kl(predicted),
      as_kl(cond_mask), as_kl(observed_mask))
    return noisy.reshape(B, K, L), jnp.sum(sumsq), jnp.sum(cnt)


# --------------------------------- main ------------------------------------- #

if __name__ == "__main__":
    key = jax.random.PRNGKey(0)
    ks = jax.random.split(key, 16)

    # ---- small config consistent with TSDE_base.__init__ ----
    B, K, L = 2, 8, 16                    # batch, num_feat (target_dim), num_timestamps
    timeemb = 32                          # config['embedding']['timeemb']
    featureemb = 16                       # config['embedding']['featureemb']
    channels = 8                          # config['embedding']['channels']
    two_ch = 2 * channels
    mts_emb_dim = 1 + two_ch              # 17
    num_classes = 4
    num_steps = 10
    beta_start, beta_end = 1e-4, 0.5      # 'linear' schedule

    def wgt(k, shape, scale=0.02, dtype=jnp.float32):
        return (scale * jax.random.normal(k, shape, jnp.float32)).astype(dtype)

    # ---- parameters (shapes from __init__); weights pre-cast to bf16 ----
    embed_table = wgt(ks[0], (K, featureemb), 1.0)            # nn.Embedding(target_dim, featureemb)
    din = L * K * mts_emb_dim
    mlp_w1 = wgt(ks[1], (din, 256), dtype=jnp.bfloat16)
    mlp_b1 = jnp.zeros((256,), jnp.float32)
    mlp_w2 = wgt(ks[2], (256, 256), dtype=jnp.bfloat16)
    mlp_b2 = jnp.zeros((256,), jnp.float32)
    mlp_w3 = wgt(ks[3], (256, num_classes), dtype=jnp.bfloat16)
    mlp_b3 = jnp.zeros((num_classes,), jnp.float32)
    conv_w = wgt(ks[4], (K, (mts_emb_dim - 1) * K), dtype=jnp.bfloat16)  # torch (out,in) layout
    conv_b = jnp.zeros((K,), jnp.float32)

    # Surrogate embedding_MTS parameters, stored output-major (lane-dense along L/K).
    # TODO(synk): replace with the real embedding_MTS (self.embdmodel) weights.
    wt_bf16 = wgt(ks[5], (two_ch, timeemb), dtype=jnp.bfloat16)
    bt = jnp.zeros((two_ch, 1), jnp.float32)
    wf_t = wgt(ks[6], (two_ch, featureemb))
    bf = jnp.zeros((two_ch, 1), jnp.float32)
    wx = wgt(ks[7], (two_ch, 1), 1.0)

    # Fused sinusoidal constants (sin/cos interleave, matches torch time_embedding).
    div = 1.0 / jnp.power(10000.0,
                          jnp.arange(0, timeemb, 2, dtype=jnp.float32) / timeemb)
    freq = jnp.repeat(div, 2).reshape(timeemb, 1)
    phase = jnp.tile(jnp.array([0.0, math.pi / 2.0], jnp.float32),
                     timeemb // 2).reshape(timeemb, 1)

    # Batch-invariant feature projection hoisted out of the kernel, tiled over L
    # so that ff[c, k*L + l] = f_feat[c, k].
    f_feat = wf_t @ embed_table.T + bf                         # (2ch, K)
    f_feat_kl = jnp.repeat(f_feat, L, axis=1)                  # (2ch, K*L)
    emb_params = (freq, phase, wt_bf16, bt, f_feat_kl, wx)

    # ---- deterministic inputs ----
    observed_data = jax.random.normal(ks[8], (B, K, L), jnp.float32)
    observed_mask = jnp.ones((B, K, L), jnp.float32)
    cond_mask = (jax.random.uniform(ks[9], (B, K, L)) > 0.3).astype(jnp.float32) * observed_mask
    observed_tp = jnp.broadcast_to(jnp.arange(L, dtype=jnp.float32)[None, :], (B, L))

    # diffusion schedule (linear)
    beta = jnp.linspace(beta_start, beta_end, num_steps)
    alpha = jnp.cumprod(1.0 - beta)
    t = jax.random.randint(ks[10], (B,), 0, num_steps)
    current_alpha = alpha[t].astype(jnp.float32)               # (B,)
    noise = jax.random.normal(ks[11], (B, K, L), jnp.float32)

    # ---- forward (pretraining): get_mts_emb + calc_loss core ----
    mts_emb = get_mts_emb(observed_tp, cond_mask, observed_data, emb_params)
    # TODO(synk): diff_Block (self.diffmodel) is an external module not provided;
    # zero surrogate prediction so the masked-MSE loss path runs end-to-end.
    predicted = jnp.zeros_like(observed_data)
    noisy_target, sum_sq, num_eval = diff_loss_core(
        observed_data, noise, predicted, cond_mask, observed_mask, current_alpha)
    loss = sum_sq / jnp.where(num_eval > 0, num_eval, 1.0)

    # ---- forward_finetuning, task='classification' ----
    mts_emb_cls = get_mts_emb(observed_tp, observed_mask, observed_data, emb_params)
    logits = mlp_head(mts_emb_cls.reshape(B, -1),
                      mlp_w1, mlp_b1, mlp_w2, mlp_b2, mlp_w3, mlp_b3)

    # ---- forward_finetuning, task='anomaly_detection', normalize_for_ad=True ----
    x_norm, means, stdev = normalize_for_ad(observed_data)
    mts_emb_ad = get_mts_emb(observed_tp, observed_mask, x_norm, emb_params)
    ad_out = ad_head(mts_emb_ad, conv_w, conv_b, stdev, means)

    jax.block_until_ready((mts_emb, noisy_target, loss, logits, ad_out))
    print("KERNEL_OK")
</pallas_src>

<mosaic_0001>
module attributes {stable_mosaic.version = 11 : i64} {
  func.func @_mts_emb_kernel(%arg0: i32, %arg1: memref<1x1x32xf32, #tpu.memory_space<vmem>>, %arg2: memref<2x1x128xf32, #tpu.memory_space<vmem>>, %arg3: memref<2x1x128xf32, #tpu.memory_space<vmem>>, %arg4: memref<32x1xf32, #tpu.memory_space<vmem>>, %arg5: memref<32x1xf32, #tpu.memory_space<vmem>>, %arg6: memref<16x32xbf16, #tpu.memory_space<vmem>>, %arg7: memref<16x1xf32, #tpu.memory_space<vmem>>, %arg8: memref<16x128xf32, #tpu.memory_space<vmem>>, %arg9: memref<16x1xf32, #tpu.memory_space<vmem>>, %arg10: memref<2x17x128xbf16, #tpu.memory_space<vmem>>) attributes {dimension_semantics = [#tpu.dimension_semantics<parallel>], iteration_bounds = array<i64: 1>, scalar_prefetch = 0 : i64, scratch_operands = 0 : i64, tpu.core_type = #tpu.core_type<tc>, window_params = [{transform_indices = @transform_0, window_bounds = array<i64: 1, 1, 32>}, {transform_indices = @transform_1, window_bounds = array<i64: 2, 1, 128>}, {transform_indices = @transform_2, window_bounds = array<i64: 2, 1, 128>}, {pipeline_mode = #tpu.pipeline_mode<synchronous>, transform_indices = @transform_3, window_bounds = array<i64: 32, 1>}, {pipeline_mode = #tpu.pipeline_mode<synchronous>, transform_indices = @transform_4, window_bounds = array<i64: 32, 1>}, {pipeline_mode = #tpu.pipeline_mode<synchronous>, transform_indices = @transform_5, window_bounds = array<i64: 16, 32>}, {pipeline_mode = #tpu.pipeline_mode<synchronous>, transform_indices = @transform_6, window_bounds = array<i64: 16, 1>}, {pipeline_mode = #tpu.pipeline_mode<synchronous>, transform_indices = @transform_7, window_bounds = array<i64: 16, 128>}, {pipeline_mode = #tpu.pipeline_mode<synchronous>, transform_indices = @transform_8, window_bounds = array<i64: 16, 1>}, {transform_indices = @transform_9, window_bounds = array<i64: 2, 17, 128>}]} {
    %c0 = arith.constant 0 : index
    %c0_0 = arith.constant 0 : index
    %c0_1 = arith.constant 0 : index
    %0 = vector.load %arg2[%c0, %c0_0, %c0_1] : memref<2x1x128xf32, #tpu.memory_space<vmem>>, vector<2x1x128xf32>
    %c0_2 = arith.constant 0 : index
    %c0_3 = arith.constant 0 : index
    %c0_4 = arith.constant 0 : index
    %1 = vector.load %arg3[%c0_2, %c0_3, %c0_4] : memref<2x1x128xf32, #tpu.memory_space<vmem>>, vector<2x1x128xf32>
    %2 = arith.mulf %0, %1 : vector<2x1x128xf32>
    %c0_5 = arith.constant 0 : index
    %c0_6 = arith.constant 0 : index
    %3 = vector.load %arg4[%c0_5, %c0_6] : memref<32x1xf32, #tpu.memory_space<vmem>>, vector<32x1xf32>
    %c0_7 = arith.constant 0 : index
    %c0_8 = arith.constant 0 : index
    %c0_9 = arith.constant 0 : index
    %4 = vector.load %arg1[%c0_7, %c0_8, %c0_9] : memref<1x1x32xf32, #tpu.memory_space<vmem>>, vector<1x1x32xf32>
    %5 = vector.shape_cast %4 : vector<1x1x32xf32> to vector<1x32xf32>
    %6 = vector.broadcast %3 : vector<32x1xf32> to vector<32x32xf32>
    %7 = vector.broadcast %5 : vector<1x32xf32> to vector<32x32xf32>
    %8 = arith.mulf %6, %7 : vector<32x32xf32>
    %c0_10 = arith.constant 0 : index
    %c0_11 = arith.constant 0 : index
    %9 = vector.load %arg5[%c0_10, %c0_11] : memref<32x1xf32, #tpu.memory_space<vmem>>, vector<32x1xf32>
    %10 = vector.broadcast %9 : vector<32x1xf32> to vector<32x32xf32>
    %11 = arith.addf %8, %10 : vector<32x32xf32>
    %12 = math.sin %11 : vector<32x32xf32>
    %c0_12 = arith.constant 0 : index
    %c0_13 = arith.constant 0 : index
    %13 = vector.load %arg6[%c0_12, %c0_13] : memref<16x32xbf16, #tpu.memory_space<vmem>>, vector<16x32xbf16>
    %14 = arith.truncf %12 : vector<32x32xf32> to vector<32x32xbf16>
    %cst = arith.constant dense<0.000000e+00> : vector<16x32xf32>
    %15 = tpu.matmul %13, %14, %cst {dimension_numbers = #tpu.dot_dimension_numbers<[1], [0], [0], [1], [0, 0, 1, 1], [], []>} : vector<16x32xbf16>, vector<32x32xbf16>, vector<16x32xf32> -> vector<16x32xf32>
    %c0_14 = arith.constant 0 : index
    %c0_15 = arith.constant 0 : index
    %16 = vector.load %arg7[%c0_14, %c0_15] : memref<16x1xf32, #tpu.memory_space<vmem>>, vector<16x1xf32>
    %17 = vector.broadcast %16 : vector<16x1xf32> to vector<16x32xf32>
    %18 = arith.addf %15, %17 : vector<16x32xf32>
    %c0_16 = arith.constant 0 : index
    %c0_17 = arith.constant 0 : index
    %19 = vector.load %arg9[%c0_16, %c0_17] : memref<16x1xf32, #tpu.memory_space<vmem>>, vector<16x1xf32>
    %c0_18 = arith.constant 0 : index
    %c0_19 = arith.constant 0 : index
    %20 = vector.load %arg8[%c0_18, %c0_19] : memref<16x128xf32, #tpu.memory_space<vmem>>, vector<16x128xf32>
    %21 = vector.extract_strided_slice %18 {offsets = [0, 0], sizes = [16, 16], strides = [1, 1]} : vector<16x32xf32> to vector<16x16xf32>
    %22 = tpu.concatenate %21, %21, %21, %21, %21, %21, %21, %21 in 1 : vector<16x16xf32>, vector<16x16xf32>, vector<16x16xf32>, vector<16x16xf32>, vector<16x16xf32>, vector<16x16xf32>, vector<16x16xf32>, vector<16x16xf32> -> vector<16x128xf32>
    %23 = vector.extract_strided_slice %2 {offsets = [0, 0, 0], sizes = [1, 1, 128], strides = [1, 1, 1]} : vector<2x1x128xf32> to vector<1x1x128xf32>
    %24 = vector.shape_cast %23 : vector<1x1x128xf32> to vector<1x128xf32>
    %25 = vector.broadcast %19 : vector<16x1xf32> to vector<16x128xf32>
    %26 = vector.broadcast %24 : vector<1x128xf32> to vector<16x128xf32>
    %27 = arith.mulf %25, %26 : vector<16x128xf32>
    %28 = arith.addf %27, %22 : vector<16x128xf32>
    %29 = arith.addf %28, %20 : vector<16x128xf32>
    %30 = math.tanh %29 : vector<16x128xf32>
    %31 = arith.truncf %30 : vector<16x128xf32> to vector<16x128xbf16>
    %c0_20 = arith.constant 0 : index
    %c0_21 = arith.constant 0 : index
    %c0_22 = arith.constant 0 : index
    %32 = vector.load %arg10[%c0_20, %c0_21, %c0_22] : memref<2x17x128xbf16, #tpu.memory_space<vmem>>, vector<1x16x128xbf16>
    %33 = vector.shape_cast %32 : vector<1x16x128xbf16> to vector<16x128xbf16>
    %34 = vector.shape_cast %31 : vector<16x128xbf16> to vector<1x16x128xbf16>
    tpu.vector_store %arg10[%c0_20, %c0_21, %c0_22], %34 {strides = array<i32>} : memref<2x17x128xbf16, #tpu.memory_space<vmem>>, vector<1x16x128xbf16>,
    %c0_23 = arith.constant 0 : index
    %c0_24 = arith.constant 0 : index
    %c0_25 = arith.constant 0 : index
    %35 = vector.load %arg2[%c0_23, %c0_24, %c0_25] : memref<2x1x128xf32, #tpu.memory_space<vmem>>, vector<1x1x128xf32>
    %36 = vector.shape_cast %35 : vector<1x1x128xf32> to vector<1x128xf32>
    %37 = arith.truncf %36 : vector<1x128xf32> to vector<1x128xbf16>
    %c0_26 = arith.constant 0 : index
    %c16 = arith.constant 16 : index
    %c0_27 = arith.constant 0 : index
    %38 = vector.load %arg10[%c0_26, %c16, %c0_27] : memref<2x17x128xbf16, #tpu.memory_space<vmem>>, vector<1x1x128xbf16>
    %39 = vector.shape_cast %38 : vector<1x1x128xbf16> to vector<1x128xbf16>
    %40 = vector.shape_cast %37 : vector<1x128xbf16> to vector<1x1x128xbf16>
    tpu.vector_store %arg10[%c0_26, %c16, %c0_27], %40 {strides = array<i32>} : memref<2x17x128xbf16, #tpu.memory_space<vmem>>, vector<1x1x128xbf16>,
    %41 = vector.extract_strided_slice %18 {offsets = [0, 16], sizes = [16, 16], strides = [1, 1]} : vector<16x32xf32> to vector<16x16xf32>
    %42 = tpu.concatenate %41, %41, %41, %41, %41, %41, %41, %41 in 1 : vector<16x16xf32>, vector<16x16xf32>, vector<16x16xf32>, vector<16x16xf32>, vector<16x16xf32>, vector<16x16xf32>, vector<16x16xf32>, vector<16x16xf32> -> vector<16x128xf32>
    %43 = vector.extract_strided_slice %2 {offsets = [1, 0, 0], sizes = [1, 1, 128], strides = [1, 1, 1]} : vector<2x1x128xf32> to vector<1x1x128xf32>
    %44 = vector.shape_cast %43 : vector<1x1x128xf32> to vector<1x128xf32>
    %45 = vector.broadcast %19 : vector<16x1xf32> to vector<16x128xf32>
    %46 = vector.broadcast %44 : vector<1x128xf32> to vector<16x128xf32>
    %47 = arith.mulf %45, %46 : vector<16x128xf32>
    %48 = arith.addf %47, %42 : vector<16x128xf32>
    %49 = arith.addf %48, %20 : vector<16x128xf32>
    %50 = math.tanh %49 : vector<16x128xf32>
    %51 = arith.truncf %50 : vector<16x128xf32> to vector<16x128xbf16>
    %c1 = arith.constant 1 : index
    %c0_28 = arith.constant 0 : index
    %c0_29 = arith.constant 0 : index
    %52 = vector.load %arg10[%c1, %c0_28, %c0_29] : memref<2x17x128xbf16, #tpu.memory_space<vmem>>, vector<1x16x128xbf16>
    %53 = vector.shape_cast %52 : vector<1x16x128xbf16> to vector<16x128xbf16>
    %54 = vector.shape_cast %51 : vector<16x128xbf16> to vector<1x16x128xbf16>
    tpu.vector_store %arg10[%c1, %c0_28, %c0_29], %54 {strides = array<i32>} : memref<2x17x128xbf16, #tpu.memory_space<vmem>>, vector<1x16x128xbf16>,
    %c1_30 = arith.constant 1 : index
    %c0_31 = arith.constant 0 : index
    %c0_32 = arith.constant 0 : index
    %55 = vector.load %arg2[%c1_30, %c0_31, %c0_32] : memref<2x1x128xf32, #tpu.memory_space<vmem>>, vector<1x1x128xf32>
    %56 = vector.shape_cast %55 : vector<1x1x128xf32> to vector<1x128xf32>
    %57 = arith.truncf %56 : vector<1x128xf32> to vector<1x128xbf16>
    %c1_33 = arith.constant 1 : index
    %c16_34 = arith.constant 16 : index
    %c0_35 = arith.constant 0 : index
    %58 = vector.load %arg10[%c1_33, %c16_34, %c0_35] : memref<2x17x128xbf16, #tpu.memory_space<vmem>>, vector<1x1x128xbf16>
    %59 = vector.shape_cast %58 : vector<1x1x128xbf16> to vector<1x128xbf16>
    %60 = vector.shape_cast %57 : vector<1x128xbf16> to vector<1x1x128xbf16>
    tpu.vector_store %arg10[%c1_33, %c16_34, %c0_35], %60 {strides = array<i32>} : memref<2x17x128xbf16, #tpu.memory_space<vmem>>, vector<1x1x128xbf16>,
    return
  }
  func.func @transform_0(%arg0: i32) -> (i32, i32, i32) {
    %c0_i32 = arith.constant 0 : i32
    %c0_i32_0 = arith.constant 0 : i32
    %c0_i32_1 = arith.constant 0 : i32
    return %arg0, %c0_i32, %c0_i32_0 : i32, i32, i32
  }
  func.func @transform_1(%arg0: i32) -> (i32, i32, i32) {
    %c0_i32 = arith.constant 0 : i32
    %c0_i32_0 = arith.constant 0 : i32
    %c0_i32_1 = arith.constant 0 : i32
    return %arg0, %c0_i32, %c0_i32_0 : i32, i32, i32
  }
  func.func @transform_2(%arg0: i32) -> (i32, i32, i32) {
    %c0_i32 = arith.constant 0 : i32
    %c0_i32_0 = arith.constant 0 : i32
    %c0_i32_1 = arith.constant 0 : i32
    return %arg0, %c0_i32, %c0_i32_0 : i32, i32, i32
  }
  func.func @transform_3(%arg0: i32) -> (i32, i32) {
    %c0_i32 = arith.constant 0 : i32
    %c0_i32_0 = arith.constant 0 : i32
    %c0_i32_1 = arith.constant 0 : i32
    return %c0_i32, %c0_i32_0 : i32, i32
  }
  func.func @transform_4(%arg0: i32) -> (i32, i32) {
    %c0_i32 = arith.constant 0 : i32
    %c0_i32_0 = arith.constant 0 : i32
    %c0_i32_1 = arith.constant 0 : i32
    return %c0_i32, %c0_i32_0 : i32, i32
  }
  func.func @transform_5(%arg0: i32) -> (i32, i32) {
    %c0_i32 = arith.constant 0 : i32
    %c0_i32_0 = arith.constant 0 : i32
    %c0_i32_1 = arith.constant 0 : i32
    return %c0_i32, %c0_i32_0 : i32, i32
  }
  func.func @transform_6(%arg0: i32) -> (i32, i32) {
    %c0_i32 = arith.constant 0 : i32
    %c0_i32_0 = arith.constant 0 : i32
    %c0_i32_1 = arith.constant 0 : i32
    return %c0_i32, %c0_i32_0 : i32, i32
  }
  func.func @transform_7(%arg0: i32) -> (i32, i32) {
    %c0_i32 = arith.constant 0 : i32
    %c0_i32_0 = arith.constant 0 : i32
    %c0_i32_1 = arith.constant 0 : i32
    return %c0_i32, %c0_i32_0 : i32, i32
  }
  func.func @transform_8(%arg0: i32) -> (i32, i32) {
    %c0_i32 = arith.constant 0 : i32
    %c0_i32_0 = arith.constant 0 : i32
    %c0_i32_1 = arith.constant 0 : i32
    return %c0_i32, %c0_i32_0 : i32, i32
  }
  func.func @transform_9(%arg0: i32) -> (i32, i32, i32) {
    %c0_i32 = arith.constant 0 : i32
    %c0_i32_0 = arith.constant 0 : i32
    %c0_i32_1 = arith.constant 0 : i32
    return %arg0, %c0_i32, %c0_i32_0 : i32, i32, i32
  }
}

</mosaic_0001>

<bundles_post_ra>
// kernel: tpu_custom_call.1
= control target key start
LH: loop header
LB: loop body
LE: loop exit
PB: predicated region body
PF: predicated region fallthrough
CT: control target
= control target key end

     0   :  { %v850_v0 = vmov 0   ;;  %vm688_vm0 = vcmask 1040384   ;;  %vm689_vm1 = vsmask.f32 256  ;;  %v851_v16 = vmov 0.0   ;;  %s859_s23 = smov 16   ;;  %s1410_s4 = inlined_call_operand.vmem [shape: f32[32,1], index: 4, kind: input, shape index: {}]   ;;  %s1411_s3 = inlined_call_operand.vmem [shape: f32[32,1], index: 3, kind: input, shape index: {}]   ;;  %s1412_s6 = inlined_call_operand.vmem [shape: f32[16,1], index: 6, kind: input, shape index: {}]   ;;  %s1413_s8 = inlined_call_operand.vmem [shape: f32[16,1], index: 8, kind: input, shape index: {}]   ;;  %s1414_s1 = inlined_call_operand.vmem [shape: f32[2,1,128], index: 1, kind: input, shape index: {}]   ;;  %s1415_s9 = inlined_call_operand.vmem [shape: bf16[2,17,128], index: 9, kind: output, shape index: {}]   ;;  %s1416_s0 = inlined_call_operand.vmem [shape: f32[1,1,32], index: 0, kind: input, shape index: {}]   ;;  %s1417_s5 = inlined_call_operand.vmem [shape: bf16[16,32], index: 5, kind: input, shape index: {}]   ;;  %s1418_s2 = inlined_call_operand.vmem [shape: f32[2,1,128], index: 2, kind: input, shape index: {}]   ;;  %s1419_s7 = inlined_call_operand.vmem [shape: f32[16,128], index: 7, kind: input, shape index: {}]  }
   0x1   :  { %824 = vset.pattern.permute.xlu1 %v850_v0  ;;  %823 = vset.pattern.permute.xlu0 %v850_v0  ;;  %v74_v1 = vld [vmem:[%s1410_s4] sm:$0xff]  ;;  %v75_v3 = vld [vmem:[%s1410_s4 + $0x8] sm:$0xff]  ;;  %v42_v5 = vld [vmem:[%s1411_s3 + $0x18] sm:$0xff]  ;;  %v852_v55 = vmov 920167782   ;;  %s860_s24 = smov 112  }
   0x2   :  { %v39_v2 = vld [vmem:[%s1411_s3] sm:$0xff]  ;;  %80 = vperm.xlu1 %824, %v74_v1   ;;  %v40_v4 = vld [vmem:[%s1411_s3 + $0x8] sm:$0xff]  ;;  %v41_v6 = vld [vmem:[%s1411_s3 + $0x10] sm:$0xff]  ;;  %783 = vmatprep.subr.bf16.mxu0 %v851_v16  ;;  %v853_v61 = vmov 2102212464   ;;  %s862_s25 = smov 48  }
   0x3   :  { %46 = vperm.xlu0 %823, %v39_v2   ;;  %v77_v7 = vld [vmem:[%s1410_s4 + $0x18] sm:$0xff]  ;;  %v76_v8 = vld [vmem:[%s1410_s4 + $0x10] sm:$0xff]  ;;  %v523_v9 = vld [vmem:[%s1412_s6 + $0x8] sm:$0xff]  ;;  %v854_v1 = vmov 1326507024   ;;  %s863_s26 = smov 64  }
   0x4   :  { %v522_v10 = vld [vmem:[%s1412_s6] sm:$0xff]  ;;  %v585_v11 = vld [vmem:[%s1413_s8 + $0x8] sm:$0xff]  ;;  %vm690_vm2 = vmand %vm688_vm0, %vm689_vm1  ;;  %s864_s27 = smov 80   ;;  %s865_s28 = smov 96  }
   0x5   :  { %v584_v12 = vld [vmem:[%s1413_s8] sm:$0xff]  ;;  %v691_v14 = vld [vmem:[%s1415_s9 + $0x8] sm:$0x1]  ;;  %v769_v17 = vld [vmem:[%s1415_s9 + $0x14] sm:$0x1] }
   0x6   :  { %85 = vperm.xlu1 %824, %v75_v3   ;;  %v686_v13 = vld [vmem:[%s1414_s1] sm:$0x1]  ;;  %v768_v18 = vld [vmem:[%s1414_s1 + $0x1] sm:$0x1] }
   0x7   :  { %51 = vperm.xlu0 %823, %v40_v4   ;;  %v687_v15 = vpack.c.bf16 %v686_v13, %v686_v13  ;;  %v735_v20 = vpack.c.bf16 %v768_v18, %v768_v18  ;;  %v743_v22 = vld [vmem:[%s1416_s0] ss:$0 sm:$0xff] }
   0x9   :  { %v692_v19 = vsel %vm690_vm2, %v687_v15, %v691_v14  ;;  %v737_v21 = vsel %vm690_vm2, %v735_v20, %v769_v17 }
   0xa   :  { %61 = vperm.xlu1 %824, %v42_v5   ;;  %693 = vst [vmem:[%s1415_s9 + $0x8] sm:$0x1] %v692_v19  ;;  %770 = vst [vmem:[%s1415_s9 + $0x14] sm:$0x1] %v737_v21 }
   0xb   :  { %56 = vperm.xlu0 %823, %v41_v6  }
   0xe   :  { %95 = vperm.xlu1 %824, %v77_v7  }
   0xf   :  { %90 = vperm.xlu0 %823, %v76_v8  }
  0x12   :  { %531 = vperm.xlu1 %824, %v523_v9  }
  0x13   :  { %526 = vperm.xlu0 %823, %v522_v10  }
  0x16   :  { %659 = vperm.xlu1 %824, %v585_v11  }
  0x17   :  { %654 = vperm.xlu0 %823, %v584_v12  }
  0x81   :  { %v81_v23 = vpop.permute.xlu1 %80 }
  0x82   :  { %v47_v24 = vpop.permute.xlu0 %46 }
  0x83   :  { %v70_v25 = vmul.f32 %v743_v22, %v47_v24 }
  0x85   :  { %v974_v26 = vadd.f32 %v81_v23, %v70_v25  ;;  %v86_v27 = vpop.permute.xlu1 %85  ;;  %v855_v23 = vmov 683565275   ;;  %v856_v25 = vmov 2475754826  }
  0x86   :  { %v52_v28 = vpop.permute.xlu0 %51 }
  0x87   :  { %v105_v29 = vand.u32 2139095040, %v974_v26  ;;  %v71_v30 = vmul.f32 %v743_v22, %v52_v28  ;;  %v102_v53 = vand.u32 2147483647, %v974_v26 }
  0x89   :  { %v106_v31 = vshrl.u32 %v105_v29, 23  ;;  %v977_v32 = vadd.f32 %v86_v27, %v71_v30  ;;  %v62_v33 = vpop.permute.xlu1 %61  ;;  %v1004_v63 = vand.u32 8388607, %v102_v53  ;;  %v857_v29 = vmov 2131351028  }
  0x8a   :  { %v57_v34 = vpop.permute.xlu0 %56  ;;  %v73_v39 = vmul.f32 %v743_v22, %v62_v33 }
  0x8b   :  { %v744_v35 = vadd.s32 4294967169, %v106_v31  ;;  %v209_v36 = vand.u32 2139095040, %v977_v32  ;;  %v72_v43 = vmul.f32 %v743_v22, %v57_v34  ;;  %v110_v12 = vor.u32 8388608, %v1004_v63 }
  0x8c   :  { %v206_v13 = vand.u32 2147483647, %v977_v32 }
  0x8d   :  { %v112_v37 = vadd.s32 1, %v744_v35  ;;  %v210_v38 = vshrl.u32 %v209_v36, 23  ;;  %v96_v40 = vpop.permute.xlu1 %95 }
  0x8e   :  { %v91_v41 = vpop.permute.xlu0 %90  ;;  %v980_v44 = vadd.f32 %v96_v40, %v73_v39 }
  0x8f   :  { %vm113_vm3 = vcmp.gt.s32.totalorder %v112_v37, 0  ;;  %v748_v42 = vadd.s32 4294967169, %v210_v38  ;;  %v984_v48 = vadd.f32 %v91_v41, %v72_v43 }
  0x90   :  { %v114_v45 = vsel %vm113_vm3, %v112_v37, 0  ;;  %v414_v49 = vand.u32 2147483647, %v980_v44  ;;  %v417_v50 = vand.u32 2139095040, %v980_v44 }
  0x91   :  { %v982_v46 = vand.u32 31, %v114_v45  ;;  %v216_v47 = vadd.s32 1, %v748_v42  ;;  %v310_v54 = vand.u32 2147483647, %v984_v48  ;;  %v313_v60 = vand.u32 2139095040, %v984_v48 }
  0x92   :  { %v418_v52 = vshrl.u32 %v417_v50, 23  ;;  %v421_v59 = vand.u32 8388607, %v414_v49  ;;  %v1006_v0 = vshrl.u32 %v114_v45, 5 }
  0x93   :  { %v989_v51 = vsub.s32 32, %v982_v46  ;;  %vm217_vm4 = vcmp.gt.s32.totalorder %v216_v47, 0  ;;  %v128_v62 = vshll.u32 %v853_v61, %v982_v46  ;;  %v314_v7 = vshrl.u32 %v313_v60, 23 }
  0x94   :  { %v995_v57 = vsel %vm217_vm4, %v216_v47, 0  ;;  %v756_v58 = vadd.s32 4294967169, %v418_v52  ;;  %v422_v6 = vor.u32 8388608, %v421_v59  ;;  %v317_v8 = vand.u32 8388607, %v310_v54 }
  0x95   :  { %v129_v56 = vshrl.u32 %v852_v55, %v989_v51  ;;  %v1010_v2 = vshrl.u32 %v854_v1, %v989_v51  ;;  %v1013_v3 = vand.u32 31, %v995_v57  ;;  %v1021_v9 = vshll.u32 %v852_v55, %v982_v46 }
  0x96   :  { %v424_v4 = vadd.s32 1, %v756_v58  ;;  %v752_v11 = vadd.s32 4294967169, %v314_v7  ;;  %vm137_vm6 = vcmp.lt.s32.totalorder %v1006_v0, 4  ;;  %v1036_v20 = vshll.u32 %v422_v6, 8 }
  0x97   :  { %v1015_v5 = vor.u32 %v129_v56, %v128_v62  ;;  %v133_v14 = vor.u32 %v1010_v2, %v1021_v9  ;;  %v1034_v19 = vsub.s32 32, %v1013_v3  ;;  %v318_v21 = vor.u32 8388608, %v317_v8 }
  0x98   :  { %vm425_vm5 = vcmp.gt.s32.totalorder %v424_v4, 0  ;;  %v320_v28 = vadd.s32 1, %v752_v11  ;;  %vm134_vm1 = vcmp.lt.s32.totalorder %v1006_v0, 1  ;;  %vm136_vm2 = vcmp.lt.s32.totalorder %v1006_v0, 3 }
  0x99   :  { %v426_v10 = vsel %vm425_vm5, %v424_v4, 0  ;;  %v1031_v18 = vsel %vm137_vm6, %v1015_v5, 920167782  ;;  %vm135_vm4 = vcmp.lt.s32.totalorder %v1006_v0, 2  ;;  %v233_v63 = vshrl.u32 %v852_v55, %v1034_v19 }
  0x9a   :  { %v427_v15 = vshrl.u32 %v426_v10, 5  ;;  %v428_v17 = vand.u32 31, %v426_v10  ;;  %vm321_vm10 = vcmp.gt.s32.totalorder %v320_v28, 0  ;;  %v226_v0 = vshll.u32 %v856_v25, %v1013_v3 }
  0x9b   :  { %v322_v47 = vsel %vm321_vm10, %v320_v28, 0 }
  0x9c   :  { %v429_v22 = vsub.s32 32, %v428_v17  ;;  %v431_v24 = vshll.u32 %v855_v23, %v428_v17  ;;  %v434_v27 = vshll.u32 %v856_v25, %v428_v17  ;;  %v437_v30 = vshll.u32 %v857_v29, %v428_v17 }
  0x9d   :  { %v440_v31 = vshll.u32 %v853_v61, %v428_v17  ;;  %v443_v33 = vshll.u32 %v852_v55, %v428_v17  ;;  %vm446_vm7 = vcmp.lt.s32.totalorder %v427_v15, 1  ;;  %vm447_vm8 = vcmp.lt.s32.totalorder %v427_v15, 2 }
  0x9e   :  { %v432_v34 = vshrl.u32 %v856_v25, %v429_v22  ;;  %v435_v35 = vshrl.u32 %v857_v29, %v429_v22  ;;  %v438_v36 = vshrl.u32 %v853_v61, %v429_v22  ;;  %v430_v37 = vshrl.u32 %v855_v23, %v429_v22 }
  0x9f   :  { %v441_v38 = vshrl.u32 %v852_v55, %v429_v22  ;;  %v444_v39 = vshrl.u32 %v854_v1, %v429_v22  ;;  %vm448_vm9 = vcmp.lt.s32.totalorder %v427_v15, 3  ;;  %vm449_vm11 = vcmp.lt.s32.totalorder %v427_v15, 4 }
  0xa0   :  { %v433_v40 = vor.u32 %v432_v34, %v431_v24  ;;  %v436_v41 = vor.u32 %v435_v35, %v434_v27  ;;  %v439_v42 = vor.u32 %v438_v36, %v437_v30  ;;  %v323_v4 = vshrl.u32 %v322_v47, 5 }
  0xa1   :  { %v442_v43 = vor.u32 %v441_v38, %v440_v31  ;;  %v445_v45 = vor.u32 %v444_v39, %v443_v33  ;;  %v324_v10 = vand.u32 31, %v322_v47  ;;  %v1058_v22 = vshll.u32 %v318_v21, 8 }
  0xa2   :  { %v450_v50 = vsel %vm446_vm7, %v430_v37, %v433_v40  ;;  %v451_v52 = vsel %vm449_vm11, %v439_v42, 2102212464  ;;  %v454_v56 = vsel %vm446_vm7, %v433_v40, %v436_v41  ;;  %v458_v58 = vsel %vm446_vm7, %v436_v41, %v439_v42 }
  0xa3   :  { %v452_v59 = vsel %vm448_vm9, %v436_v41, %v451_v52  ;;  %v455_v60 = vsel %vm449_vm11, %v442_v43, 920167782  ;;  %v459_v62 = vsel %vm449_vm11, %v445_v45, 1326507024  ;;  %v119_v24 = vshll.u32 %v855_v23, %v982_v46 }
  0xa4   :  { %v453_v6 = vsel %vm447_vm8, %v450_v50, %v452_v59  ;;  %v456_v7 = vsel %vm448_vm9, %v439_v42, %v455_v60  ;;  %v460_v8 = vsel %vm448_vm9, %v442_v43, %v459_v62  ;;  %v325_v34 = vsub.s32 32, %v324_v10 }
  0xa5   :  { %v457_v11 = vsel %vm447_vm8, %v454_v56, %v456_v7  ;;  %v461_v17 = vsel %vm447_vm8, %v458_v58, %v460_v8  ;;  %v469_v33 = vmul.u32 %v1036_v20, %v453_v6  ;;  %v327_v15 = vshll.u32 %v855_v23, %v324_v10 }
  0xa6   :  { %v1063_v27 = vmul.u32.u64.low %v1036_v20, %v461_v17  ;;  %v1064_v28 = vmul.u32.u64.high %v1036_v20, %v461_v17, %v1063_v27  ;;  %v1067_v30 = vmul.u32.u64.low %v1036_v20, %v457_v11  ;;  %v1068_v31 = vmul.u32.u64.high %v1036_v20, %v457_v11, %v1067_v30 }
  0xa7   :  { %vm342_vm12 = vcmp.lt.s32.totalorder %v323_v4, 1  ;;  %v330_v21 = vshll.u32 %v856_v25, %v324_v10  ;;  %v333_v35 = vshll.u32 %v857_v29, %v324_v10  ;;  %v336_v36 = vshll.u32 %v853_v61, %v324_v10 }
  0xa8   :  { %v339_v37 = vshll.u32 %v852_v55, %v324_v10  ;;  %v328_v38 = vshrl.u32 %v856_v25, %v325_v34  ;;  %v331_v39 = vshrl.u32 %v857_v29, %v325_v34  ;;  %v334_v40 = vshrl.u32 %v853_v61, %v325_v34 }
  0xa9   :  { %vm344_vm13 = vcmp.lt.s32.totalorder %v323_v4, 3  ;;  %vm471_vm14 = vc.u32 %v1064_v28, %v1067_v30  ;;  %v472_v20 = vadd.s32 1, %v1068_v31  ;;  %v326_v41 = vshrl.u32 %v855_v23, %v325_v34 }
  0xaa   :  { %v337_v42 = vshrl.u32 %v852_v55, %v325_v34  ;;  %v329_v43 = vor.u32 %v328_v38, %v327_v15  ;;  %v332_v45 = vor.u32 %v331_v39, %v330_v21  ;;  %v335_v47 = vor.u32 %v334_v40, %v333_v35 }
  0xab   :  { %v340_v50 = vshrl.u32 %v854_v1, %v325_v34  ;;  %v473_v52 = vsel %vm471_vm14, %v472_v20, %v1068_v31  ;;  %vm345_vm15 = vcmp.lt.s32.totalorder %v323_v4, 4  ;;  %v120_v58 = vshrl.u32 %v856_v25, %v989_v51 }
  0xac   :  { %v338_v56 = vor.u32 %v337_v42, %v336_v36  ;;  %v474_v59 = vadd.s32 %v473_v52, %v469_v33  ;;  %v346_v62 = vsel %vm342_vm12, %v326_v41, %v329_v43  ;;  %v347_v6 = vsel %vm345_vm15, %v335_v47, 2102212464 }
  0xad   :  { %v341_v60 = vor.u32 %v340_v50, %v339_v37  ;;  %v348_v7 = vsel %vm344_vm13, %v332_v45, %v347_v6  ;;  %v350_v8 = vsel %vm342_vm12, %v329_v43, %v332_v45  ;;  %v354_v11 = vsel %vm342_vm12, %v332_v45, %v335_v47 }
  0xae   :  { %v351_v10 = vsel %vm345_vm15, %v338_v56, 920167782  ;;  %v475_v17 = vadd.s32 536870912, %v474_v59  ;;  %vm343_vm0 = vcmp.lt.s32.totalorder %v323_v4, 2  ;;  %v121_v21 = vor.u32 %v120_v58, %v119_v24 }
  0xaf   :  { %v352_v27 = vsel %vm344_vm13, %v335_v47, %v351_v10  ;;  %v355_v31 = vsel %vm345_vm15, %v341_v60, 1326507024  ;;  %v349_v34 = vsel %vm343_vm0, %v346_v62, %v348_v7  ;;  %v122_v20 = vshll.u32 %v856_v25, %v982_v46 }
  0xb0   :  { %v353_v15 = vsel %vm343_vm0, %v350_v8, %v352_v27  ;;  %v356_v33 = vsel %vm344_vm13, %v338_v56, %v355_v31  ;;  %v1095_v35 = vshrl.u32 %v475_v17, 30  ;;  %v123_v4 = vshrl.u32 %v857_v29, %v989_v51 }
  0xb1   :  { %v357_v36 = vsel %vm343_vm0, %v354_v11, %v356_v33  ;;  %v1098_v37 = vmul.u32.u64.low %v1058_v22, %v353_v15  ;;  %v1099_v38 = vmul.u32.u64.high %v1058_v22, %v353_v15, %v1098_v37  ;;  %v147_v24 = vsel %vm137_vm6, %v133_v14, 1326507024 }
  0xb2   :  { %v1103_v39 = vmul.u32.u64.low %v1058_v22, %v357_v36  ;;  %v1104_v40 = vmul.u32.u64.high %v1058_v22, %v357_v36, %v1103_v39  ;;  %v477_v41 = vshll.u32 %v1095_v35, 30  ;;  %v125_v42 = vshll.u32 %v857_v29, %v982_v46 }
  0xb3   :  { %v126_v43 = vshrl.u32 %v853_v61, %v989_v51  ;;  %v365_v45 = vmul.u32 %v1058_v22, %v349_v34  ;;  %v118_v47 = vshrl.u32 %v855_v23, %v989_v51  ;;  %v124_v50 = vor.u32 %v123_v4, %v122_v20 }
  0xb4   :  { %v1124_v2 = vsub.s32 %v474_v59, %v477_v41  ;;  %v368_v9 = vadd.s32 1, %v1099_v38  ;;  %vm367_vm3 = vc.u32 %v1104_v40, %v1098_v37  ;;  %v148_v51 = vsel %vm136_vm2, %v1015_v5, %v147_v24 }
  0xb5   :  { %v127_v14 = vor.u32 %v126_v43, %v125_v42  ;;  %v142_v46 = vsel %vm134_vm1, %v121_v21, %v124_v50  ;;  %v150_v5 = vshll.u32 %v110_v12, 8  ;;  %v236_v6 = vshrl.u32 %v854_v1, %v1034_v19 }
  0xb6   :  { %v480_v22 = vsub.s32 0, %v1124_v2  ;;  %v369_v52 = vsel %vm367_vm3, %v368_v9, %v1099_v38  ;;  %v138_v8 = vsel %vm134_vm1, %v118_v47, %v121_v21  ;;  %v213_v31 = vand.u32 8388607, %v206_v13 }
  0xb7   :  { %v139_v56 = vsel %vm137_vm6, %v127_v14, 2102212464  ;;  %v144_v58 = vsel %vm136_vm2, %v127_v14, %v1031_v18  ;;  %v370_v59 = vadd.s32 %v369_v52, %v365_v45  ;;  %v146_v62 = vsel %vm134_vm1, %v124_v50, %v127_v14 }
  0xb8   :  { %v145_v60 = vsel %vm135_vm4, %v142_v46, %v144_v58  ;;  %v757_v7 = vmin.u32 %v480_v22, %v1124_v2  ;;  %v149_v18 = vsel %vm135_vm4, %v146_v62, %v148_v51  ;;  %v140_v11 = vsel %vm136_vm2, %v124_v50, %v139_v56 }
  0xb9   :  { %v371_v10 = vadd.s32 536870912, %v370_v59  ;;  %v1158_v17 = vmul.u32.u64.low %v150_v5, %v149_v18  ;;  %v1159_v27 = vmul.u32.u64.high %v150_v5, %v149_v18, %v1158_v17  ;;  %v1170_v34 = vshrl.u32 %v995_v57, 5 }
  0xba   :  { %v1163_v12 = vmul.u32.u64.low %v150_v5, %v145_v60  ;;  %v1164_v1 = vmul.u32.u64.high %v150_v5, %v145_v60, %v1163_v12  ;;  %v232_v15 = vshll.u32 %v853_v61, %v1013_v3  ;;  %v235_v33 = vshll.u32 %v852_v55, %v1013_v3 }
  0xbb   :  { %v1176_v21 = vshrl.u32 %v371_v10, 30  ;;  %v482_v36 = vclz %v757_v7  ;;  %v141_v38 = vsel %vm135_vm4, %v138_v8, %v140_v11  ;;  %v227_v39 = vshrl.u32 %v857_v29, %v1034_v19 }
  0xbc   :  { %v230_v20 = vshrl.u32 %v853_v61, %v1034_v19  ;;  %v237_v57 = vor.u32 %v236_v6, %v235_v33  ;;  %vm159_vm5 = vc.u32 %v1159_v27, %v1163_v12  ;;  %v224_v55 = vshrl.u32 %v856_v25, %v1034_v19 }
  0xbd   :  { %v373_v4 = vshll.u32 %v1176_v21, 30  ;;  %v234_v24 = vor.u32 %v233_v63, %v232_v15  ;;  %v160_v41 = vadd.s32 1, %v1164_v1  ;;  %v229_v42 = vshll.u32 %v857_v29, %v1013_v3 }
  0xbe   :  { %vm241_vm6 = vcmp.lt.s32.totalorder %v1170_v34, 4  ;;  %v157_v43 = vmul.u32 %v150_v5, %v141_v38  ;;  %v223_v45 = vshll.u32 %v855_v23, %v1013_v3  ;;  %v758_v47 = vadd.s32 4294967294, %v482_v36 }
  0xbf   :  { %v1195_v61 = vsub.s32 %v370_v59, %v373_v4  ;;  %v161_v50 = vsel %vm159_vm5, %v160_v41, %v1164_v1  ;;  %v228_v9 = vor.u32 %v227_v39, %v226_v0  ;;  %v231_v14 = vor.u32 %v230_v20, %v229_v42 }
  0xc0   :  { %v251_v46 = vsel %vm241_vm6, %v237_v57, 1326507024  ;;  %v162_v51 = vadd.s32 %v161_v50, %v157_v43  ;;  %v225_v29 = vor.u32 %v224_v55, %v223_v45  ;;  %v247_v22 = vsel %vm241_vm6, %v234_v24, 920167782 }
  0xc1   :  { %v376_v25 = vsub.s32 0, %v1195_v61  ;;  %v214_v52 = vor.u32 8388608, %v213_v31  ;;  %vm238_vm7 = vcmp.lt.s32.totalorder %v1170_v34, 1  ;;  %vm240_vm8 = vcmp.lt.s32.totalorder %v1170_v34, 3 }
  0xc2   :  { %v163_v58 = vadd.s32 536870912, %v162_v51  ;;  %vm759_vm9 = vcmp.lt.s32.totalorder %v758_v47, 0  ;;  %vm239_vm10 = vcmp.lt.s32.totalorder %v1170_v34, 2  ;;  %v250_v3 = vsel %vm238_vm7, %v228_v9, %v231_v14 }
  0xc3   :  { %v753_v56 = vmin.u32 %v376_v25, %v1195_v61  ;;  %v252_v59 = vsel %vm240_vm8, %v234_v24, %v251_v46  ;;  %v246_v5 = vsel %vm238_vm7, %v225_v29, %v228_v9  ;;  %v248_v6 = vsel %vm240_vm8, %v231_v14, %v247_v22 }
  0xc4   :  { %v1213_v62 = vshrl.u32 %v163_v58, 30  ;;  %v253_v7 = vsel %vm239_vm10, %v250_v3, %v252_v59  ;;  %v254_v10 = vshll.u32 %v214_v52, 8  ;;  %v485_v11 = vsel %vm759_vm9, 0, %v758_v47 }
  0xc5   :  { %v378_v60 = vclz %v753_v56  ;;  %v249_v17 = vsel %vm239_vm10, %v246_v5, %v248_v6  ;;  %v243_v15 = vsel %vm241_vm6, %v231_v14, 2102212464  ;;  %v490_v33 = vsub.s32 4294967266, %v485_v11 }
  0xc6   :  { %v165_v18 = vshll.u32 %v1213_v62, 30  ;;  %v1224_v1 = vmul.u32.u64.low %v254_v10, %v253_v7  ;;  %v1225_v31 = vmul.u32.u64.high %v254_v10, %v253_v7, %v1224_v1  ;;  %v222_v39 = vshrl.u32 %v855_v23, %v1034_v19 }
  0xc7   :  { %v754_v8 = vadd.s32 4294967294, %v378_v60  ;;  %v1231_v20 = vmul.u32.u64.low %v254_v10, %v249_v17  ;;  %v1232_v57 = vmul.u32.u64.high %v254_v10, %v249_v17, %v1231_v20  ;;  %v244_v24 = vsel %vm240_vm8, %v228_v9, %v243_v15 }
  0xc8   :  { %v166_v63 = vsub.s32 %v162_v51, %v165_v18  ;;  %v242_v55 = vsel %vm238_vm7, %v222_v39, %v225_v29  ;;  %v491_v0 = vadd.s32 127, %v490_v33  ;;  %v486_v45 = vsub.s32 32, %v485_v11 }
  0xc9   :  { %vm755_vm11 = vcmp.lt.s32.totalorder %v754_v8, 0  ;;  %v245_v43 = vsel %vm239_vm10, %v242_v55, %v244_v24  ;;  %vm263_vm12 = vc.u32 %v1225_v31, %v1231_v20  ;;  %v264_v23 = vadd.s32 1, %v1232_v57 }
  0xca   :  { %v381_v36 = vsel %vm755_vm11, 0, %v754_v8  ;;  %v168_v38 = vsub.s32 0, %v166_v63  ;;  %v470_v50 = vadd.s32 %v1067_v30, %v1064_v28  ;;  %v492_v14 = vshll.u32 %v491_v0, 23 }
  0xcb   :  { %v386_v41 = vsub.s32 4294967266, %v381_v36  ;;  %v261_v9 = vmul.u32 %v254_v10, %v245_v43  ;;  %v382_v46 = vsub.s32 32, %v381_v36  ;;  %v265_v51 = vsel %vm263_vm12, %v264_v23, %v1232_v57 }
  0xcc   :  { %v745_v4 = vmin.u32 %v168_v38, %v166_v63  ;;  %v488_v34 = vshrl.u32 %v470_v50, %v486_v45  ;;  %vm858_vm14 = vmmov 0   ;;  %v366_v22 = vadd.s32 %v1098_v37, %v1104_v40 }
  0xcd   :  { %v387_v19 = vadd.s32 127, %v386_v41  ;;  %787 = vmatprep.mubr.msk.bf16.mxu0 %vm858_vm14, %v851_v16  ;;  %v266_v58 = vadd.s32 %v265_v51, %v261_v9  ;;  %v487_v28 = vshll.u32 %v1124_v2, %v485_v11  ;;  %v493_v30 = vor.u32 4788187, %v492_v14 }
  0xce   :  { %v170_v42 = vclz %v745_v4  ;;  %v384_v59 = vshrl.u32 %v366_v22, %v382_v46  ;;  %v158_v60 = vadd.s32 %v1163_v12, %v1159_v27  ;;  %v383_v8 = vshll.u32 %v1195_v61, %v381_v36 }
  0xcf   :  { %v388_v52 = vshll.u32 %v387_v19, 23  ;;  %v267_v5 = vadd.s32 536870912, %v266_v58  ;;  %v489_v6 = vor.u32 %v488_v34, %v487_v28  ;;  %v494_v37 = vand.u32 2147483647, %v493_v30 }
  0xd0   :  { %v746_v47 = vadd.s32 4294967294, %v170_v42  ;;  %v385_v40 = vor.u32 %v384_v59, %v383_v8  ;;  %vm416_vm15 = vcmp.lt.s32.totalorder %v980_v44, 0  ;;  %vm1262_vm1 = vcmp.le.f32.partialorder %v414_v49, 0.7853982 }
  0xd1   :  { %v389_v18 = vor.u32 4788187, %v388_v52  ;;  %v1254_v17 = vshrl.u32 %v267_v5, 30  ;;  %v496_v11 = vcvt.s32.f32 %v489_v6  ;;  %vm312_vm2 = vcmp.lt.s32.totalorder %v984_v48, 0 }
  0xd2   :  { %vm747_vm13 = vcmp.lt.s32.totalorder %v746_v47, 0  ;;  %v392_v12 = vcvt.s32.f32 %v385_v40  ;;  %v262_v50 = vadd.s32 %v1231_v20, %v1225_v31  ;;  %vm1276_vm3 = vcmp.le.f32.partialorder %v310_v54, 0.7853982 }
  0xd3   :  { %v173_v25 = vsel %vm747_vm13, 0, %v746_v47  ;;  %v269_v2 = vshll.u32 %v1254_v17, 30  ;;  %v390_v33 = vand.u32 2147483647, %v389_v18  ;;  %v497_v27 = vmul.f32 %v496_v11, %v494_v37  ;;  %v33_v37 = vld [vmem:[%s1414_s1] sm:$0x1] }
  0xd4   :  { %v178_v29 = vsub.s32 4294967266, %v173_v25  ;;  %v174_v56 = vsub.s32 32, %v173_v25  ;;  %v175_v1 = vshll.u32 %v166_v63, %v173_v25  ;;  %vm104_vm4 = vcmp.lt.s32.totalorder %v974_v26, 0 }
  0xd5   :  { %v270_v39 = vsub.s32 %v266_v58, %v269_v2  ;;  %v393_v55 = vmul.f32 %v392_v12, %v390_v33  ;;  %v498_v24 = vxor.u32 2147483648, %v497_v27  ;;  %vm1288_vm5 = vcmp.le.f32.partialorder %v102_v53, 0.7853982 }
  0xd6   :  { %v179_v3 = vadd.s32 127, %v178_v29  ;;  %v176_v10 = vshrl.u32 %v158_v60, %v174_v56  ;;  %v188_v52 = vsub.s32 4, %v1213_v62  ;;  %v500_v28 = vsub.s32 4, %v1095_v35 }
  0xd7   :  { %v272_v4 = vsub.s32 0, %v270_v39  ;;  %v394_v42 = vxor.u32 2147483648, %v393_v55  ;;  %v499_v63 = vsel %vm416_vm15, %v498_v24, %v497_v27  ;;  %v396_v30 = vsub.s32 4, %v1176_v21 }
  0xd8   :  { %v180_v7 = vshll.u32 %v179_v3, 23  ;;  %v177_v38 = vor.u32 %v176_v10, %v175_v1  ;;  %v502_v46 = vsel %vm1262_vm1, %v980_v44, %v499_v63  ;;  %v189_v59 = vsel %vm104_vm4, %v188_v52, %v1213_v62 }
  0xd9   :  { %v749_v36 = vmin.u32 %v272_v4, %v270_v39  ;;  %v395_v23 = vsel %vm312_vm2, %v394_v42, %v393_v55  ;;  %826 = vcosq.f32 %v502_v46  ;;  %v292_v5 = vsub.s32 4, %v1254_v17 }
  0xda   :  { %v181_v15 = vor.u32 4788187, %v180_v7  ;;  %v184_v61 = vcvt.s32.f32 %v177_v38  ;;  %v398_v20 = vsel %vm1276_vm3, %v984_v48, %v395_v23  ;;  %828 = vsinq.f32 %v502_v46 }
  0xdb   :  { %v274_v0 = vclz %v749_v36  ;;  %830 = vcosq.f32 %v398_v20  ;;  %v501_v6 = vsel %vm416_vm15, %v500_v28, %v1095_v35  ;;  %v397_v7 = vsel %vm312_vm2, %v396_v30, %v1176_v21 }
  0xdc   :  { %v182_v57 = vand.u32 2147483647, %v181_v15  ;;  %832 = vsinq.f32 %v398_v20  ;;  %v191_v8 = vsel %vm1288_vm5, 0, %v189_v59  ;;  %vm208_vm6 = vcmp.lt.s32.totalorder %v977_v32, 0 }
  0xdd   :  { %v750_v43 = vadd.s32 4294967294, %v274_v0  ;;  %v503_v62 = vsel %vm1262_vm1, 0, %v501_v6  ;;  %vm1315_vm7 = vcmp.le.f32.partialorder %v206_v13, 0.7853982  ;;  %v293_v40 = vsel %vm208_vm6, %v292_v5, %v1254_v17 }
  0xde   :  { %v185_v41 = vmul.f32 %v184_v61, %v182_v57  ;;  %v399_v21 = vsel %vm1276_vm3, 0, %v397_v7  ;;  %v195_v15 = vadd.s32 3, %v191_v8  ;;  %v507_v33 = vadd.s32 3, %v503_v62 }
  0xdf   :  { %vm751_vm0 = vcmp.lt.s32.totalorder %v750_v43, 0  ;;  %v295_v13 = vsel %vm1315_vm7, 0, %v293_v40  ;;  %vm194_vm3 = vweird.f32 %v974_v26  ;;  %v663_v8 = vlaneseq  ;;  %v35_v40 = vld [vmem:[%s1418_s2] sm:$0x1] }
  0xe0   :  { %v186_v45 = vxor.u32 2147483648, %v185_v41  ;;  %v277_v19 = vsel %vm751_vm0, 0, %v750_v43  ;;  %v196_v12 = vand.u32 3, %v195_v15  ;;  %v299_v57 = vadd.s32 3, %v295_v13 }
  0xe1   :  { %v278_v14 = vsub.s32 32, %v277_v19  ;;  %v282_v9 = vsub.s32 4294967266, %v277_v19  ;;  %v279_v51 = vshll.u32 %v270_v39, %v277_v19  ;;  %v403_v39 = vadd.s32 3, %v399_v21  ;;  %v36_v21 = vld [vmem:[%s1418_s2 + $0x1] sm:$0x1] }
  0xe2   :  { %v187_v25 = vsel %vm104_vm4, %v186_v45, %v185_v41  ;;  %v508_v4 = vand.u32 3, %v507_v33  ;;  %vm198_vm8 = vcmp.eq.s32.totalorder %v196_v12, 0  ;;  %vm201_vm9 = vcmp.eq.s32.totalorder %v196_v12, 2 }
  0xe3   :  { %v280_v34 = vshrl.u32 %v262_v50, %v278_v14  ;;  %v283_v31 = vadd.s32 127, %v282_v9  ;;  %v190_v56 = vsel %vm1288_vm5, %v974_v26, %v187_v25  ;;  %v827_v10 = vpop.eup %826  ;;  %v404_v55 = vand.u32 3, %v403_v39  ;;  %v825_v26 = vld [vmem:[%s1417_s5] sm:$0xff]   ;;  %s861_s5 = smov 32  }
  0xe4   :  { %834 = vcosq.f32 %v190_v56  ;;  %v829_v1 = vpop.eup %828  ;;  %v514_v36 = vxor.u32 2147483648, %v827_v10  ;;  %v300_v43 = vand.u32 3, %v299_v57  ;;  %vm510_vm10 = vcmp.eq.s32.totalorder %v508_v4, 0 }
  0xe5   :  { %v281_v29 = vor.u32 %v280_v34, %v279_v51  ;;  %v284_v22 = vshll.u32 %v283_v31, 23  ;;  %836 = vsinq.f32 %v190_v56  ;;  %v831_v11 = vpop.eup %830  ;;  %v511_v61 = vxor.u32 2147483648, %v829_v1 }
  0xe6   :  { %v833_v38 = vpop.eup %832  ;;  %v410_v42 = vxor.u32 2147483648, %v831_v11  ;;  %vm513_vm11 = vcmp.eq.s32.totalorder %v508_v4, 2  ;;  %vm406_vm12 = vcmp.eq.s32.totalorder %v404_v55, 0  ;;  %vm409_vm13 = vcmp.eq.s32.totalorder %v404_v55, 2 }
  0xe7   :  { %v285_v58 = vor.u32 4788187, %v284_v22  ;;  %v288_v3 = vcvt.s32.f32 %v281_v29  ;;  %v407_v0 = vxor.u32 2147483648, %v833_v38  ;;  %v512_v63 = vsel %vm510_vm10, %v827_v10, %v511_v61 }
  0xe8   :  { %v515_v45 = vsel %vm513_vm11, %v514_v36, %v829_v1  ;;  %v411_v14 = vsel %vm409_vm13, %v410_v42, %v833_v38  ;;  %vm197_vm14 = vcmp.lt.s32.totalorder %v196_v12, 2  ;;  %vm509_vm15 = vcmp.lt.s32.totalorder %v508_v4, 2 }
  0xe9   :  { %v286_v53 = vand.u32 2147483647, %v285_v58  ;;  %v408_v50 = vsel %vm406_vm12, %v831_v11, %v407_v0  ;;  %vm305_vm0 = vcmp.eq.s32.totalorder %v300_v43, 2  ;;  %vm405_vm1 = vcmp.lt.s32.totalorder %v404_v55, 2 }
  0xea   :  { %v516_v25 = vsel %vm509_vm15, %v512_v63, %v515_v45  ;;  %vm302_vm2 = vcmp.eq.s32.totalorder %v300_v43, 0  ;;  %v412_v31 = vsel %vm405_vm1, %v408_v50, %v411_v14  ;;  %vm301_vm4 = vcmp.lt.s32.totalorder %v300_v43, 2 }
  0xeb   :  { %v289_v60 = vmul.f32 %v288_v3, %v286_v53  ;;  %vm298_vm5 = vweird.f32 %v977_v32  ;;  %v532_v53 = vpop.permute.xlu1 %531  ;;  %v664_v10 = vshrl.u32 %v663_v8, 7  ;;  %v37_v11 = vmul.f32 %v35_v40, %v33_v37 }
  0xec   :  { %vm637_vm10 = vcmask 392192   ;;  %vm640_vm11 = vcmask 523264   ;;  %vm643_vm12 = vcmask 654336   ;;  %vm646_vm13 = vcmask 785408  }
  0xed   :  { %v290_v18 = vxor.u32 2147483648, %v289_v60 }
  0xee   :  { %v835_v27 = vpop.eup %834 }
  0xef   :  { %v291_v35 = vsel %vm208_vm6, %v290_v18, %v289_v60  ;;  %v837_v17 = vpop.eup %836  ;;  %v202_v41 = vxor.u32 2147483648, %v835_v27  ;;  %vm402_vm6 = vweird.f32 %v984_v48  ;;  %v1345_v5 = vpop.permute.xlu1 %659 }
  0xf0   :  { %v294_v2 = vsel %vm1315_vm7, %v977_v32, %v291_v35  ;;  %v199_v24 = vxor.u32 2147483648, %v837_v17  ;;  %vm506_vm7 = vweird.f32 %v980_v44  ;;  %v413_v52 = vsel %vm402_vm6, nan, %v412_v31  ;;  %v527_v32 = vpop.permute.xlu0 %526  ;;  %v34_v35 = vld [vmem:[%s1414_s1 + $0x1] sm:$0x1] }
  0xf1   :  { %838 = vcosq.f32 %v294_v2  ;;  %v203_v23 = vsel %vm201_vm9, %v202_v41, %v837_v17  ;;  %v517_v56 = vsel %vm506_vm7, nan, %v516_v25  ;;  %v38_v33 = vmul.f32 %v36_v21, %v34_v35 }
  0xf2   :  { %840 = vsinq.f32 %v294_v2  ;;  %v200_v19 = vsel %vm198_vm8, %v835_v27, %v199_v24  ;;  %v521_v28 = vpack.c.bf16 %v517_v56, %v413_v52  ;;  %vm539_vm8 = vcmask 261120  }
  0xf3   :  { %v204_v51 = vsel %vm197_vm14, %v200_v19, %v203_v23  ;;  %v665_v2 = vsub.s32 0, %v664_v10  ;;  %vm632_vm9 = vcmask 130048   ;;  %vm649_vm14 = vcmask 916480  }
  0xf4   :  { %v205_v29 = vsel %vm194_vm3, nan, %v204_v51 }
  0xf5   :  { %v666_v39 = vrot.slane %v37_v11, %v665_v2  ;;  %v712_v27 = vrot.slane %v38_v33, %v665_v2 }
  0xf7   :  { %v715_v4 = vmul.f32 %v712_v27, %v1345_v5 }
  0xfb   :  { %v839_v47 = vpop.eup %838 }
  0xfc   :  { %v841_v9 = vpop.eup %840  ;;  %v306_v46 = vxor.u32 2147483648, %v839_v47 }
  0xfd   :  { %v303_v49 = vxor.u32 2147483648, %v841_v9 }
  0xfe   :  { %v307_v34 = vsel %vm305_vm0, %v306_v46, %v841_v9 }
  0xff   :  { %v304_v20 = vsel %vm302_vm2, %v839_v47, %v303_v49 }
 0x100   :  { %v308_v54 = vsel %vm301_vm4, %v304_v20, %v307_v34 }
 0x101   :  { %v309_v22 = vsel %vm298_vm5, nan, %v308_v54 }
 0x102   :  { %v520_v58 = vpack.c.bf16 %v309_v22, %v205_v29  ;;  %v586_v29 = vld [vmem:[%s1419_s7] sm:$0xff] }
 0x104   :  { %784 = vmatpush3.bf16.msra.mxu0 %v520_v58 }
 0x105   :  { %785 = vmatprep.subr.bf16.mxu0 %v851_v16  ;;  %v655_v16 = vpop.permute.xlu0 %654 }
 0x106   :  { %v668_v55 = vmul.f32 %v666_v39, %v655_v16  ;;  %v714_v36 = vmul.f32 %v712_v27, %v655_v16 }
 0x108   :  { %786 = vmatpush3.bf16.msra.mxu0 %v521_v28 }
 0x10b   :  { %788 = vmatmul.mubr.msk.bf16.vlgmr.msra.gmra.mrb[0].mxu0 %vm539_vm8, %v825_v26 }
 0x1de   :  { %v577_v48 = vpop.f32.mrb[0].mxu0 }
 0x1df   :  { %v578_v44 = vadd.f32 %v577_v48, %v527_v32  ;;  %v789_v30 = vpop.f32.mrb[1].mxu0  ;;  %v669_v48 = vmul.f32 %v666_v39, %v1345_v5 }
 0x1e0   :  { %v580_v3 = vpop.f32.mrb[2].mxu0  ;;  %v587_v30 = vld [vmem:[%s1419_s7 + $0x8] sm:$0xff] }
 0x1e1   :  { %v1336_v59 = vadd.f32 %v580_v3, %v532_v53  ;;  %590 = vrot.lane.b32.xlu0 %v578_v44, %s859_s23  ;;  %v790_v60 = vpop.f32.mrb[3].mxu0 }
 0x1e3   :  { %592 = vrot.lane.b32.xlu1 %v1336_v59, %s859_s23 }
 0x1e5   :  { %626 = vrot.lane.b32.xlu0 %v578_v44, %s860_s24 }
 0x1e7   :  { %628 = vrot.lane.b32.xlu1 %v1336_v59, %s860_s24 }
 0x1e9   :  { %596 = vrot.lane.b32.xlu0 %v578_v44, %s861_s5 }
 0x1eb   :  { %598 = vrot.lane.b32.xlu1 %v1336_v59, %s861_s5 }
 0x1ed   :  { %602 = vrot.lane.b32.xlu0 %v578_v44, %s862_s25 }
 0x1ef   :  { %604 = vrot.lane.b32.xlu1 %v1336_v59, %s862_s25 }
 0x1f1   :  { %608 = vrot.lane.b32.xlu0 %v578_v44, %s863_s26 }
 0x1f3   :  { %610 = vrot.lane.b32.xlu1 %v1336_v59, %s863_s26 }
 0x1f5   :  { %614 = vrot.lane.b32.xlu0 %v578_v44, %s864_s27 }
 0x1f7   :  { %616 = vrot.lane.b32.xlu1 %v1336_v59, %s864_s27 }
 0x1f9   :  { %620 = vrot.lane.b32.xlu0 %v578_v44, %s865_s28 }
 0x1fb   :  { %622 = vrot.lane.b32.xlu1 %v1336_v59, %s865_s28 }
 0x253   :  { %v591_v6 = vpop.permute.xlu0 %590 }
 0x254   :  { %v633_v24 = vsel %vm632_vm9, %v578_v44, %v591_v6 }
 0x255   :  { %v593_v7 = vpop.permute.xlu1 %592 }
 0x256   :  { %v634_v63 = vsel %vm632_vm9, %v1336_v59, %v593_v7 }
 0x257   :  { %v627_v18 = vpop.permute.xlu0 %626 }
 0x258   :  { %v694_v12 = vsel %vm632_vm9, %v627_v18, %v578_v44 }
 0x259   :  { %v1347_v62 = vpop.permute.xlu1 %628  ;;  %v696_v41 = vsel %vm539_vm8, %v694_v12, %v591_v6 }
 0x25a   :  { %v695_v61 = vsel %vm632_vm9, %v1347_v62, %v1336_v59 }
 0x25b   :  { %v597_v1 = vpop.permute.xlu0 %596  ;;  %v697_v45 = vsel %vm539_vm8, %v695_v61, %v593_v7 }
 0x25c   :  { %v635_v42 = vsel %vm539_vm8, %v633_v24, %v597_v1  ;;  %v698_v43 = vsel %vm637_vm10, %v696_v41, %v597_v1 }
 0x25d   :  { %v599_v15 = vpop.permute.xlu1 %598 }
 0x25e   :  { %v636_v50 = vsel %vm539_vm8, %v634_v63, %v599_v15  ;;  %v699_v14 = vsel %vm637_vm10, %v697_v45, %v599_v15 }
 0x25f   :  { %v603_v38 = vpop.permute.xlu0 %602 }
 0x260   :  { %v638_v47 = vsel %vm637_vm10, %v635_v42, %v603_v38  ;;  %v700_v19 = vsel %vm640_vm11, %v698_v43, %v603_v38 }
 0x261   :  { %v605_v13 = vpop.permute.xlu1 %604 }
 0x262   :  { %v639_v49 = vsel %vm637_vm10, %v636_v50, %v605_v13  ;;  %v701_v25 = vsel %vm640_vm11, %v699_v14, %v605_v13 }
 0x263   :  { %v609_v17 = vpop.permute.xlu0 %608 }
 0x264   :  { %v641_v9 = vsel %vm640_vm11, %v638_v47, %v609_v17  ;;  %v702_v46 = vsel %vm643_vm12, %v700_v19, %v609_v17 }
 0x265   :  { %v611_v57 = vpop.permute.xlu1 %610 }
 0x266   :  { %v642_v20 = vsel %vm640_vm11, %v639_v49, %v611_v57  ;;  %v703_v54 = vsel %vm643_vm12, %v701_v25, %v611_v57 }
 0x267   :  { %v615_v0 = vpop.permute.xlu0 %614 }
 0x268   :  { %v644_v51 = vsel %vm643_vm12, %v641_v9, %v615_v0  ;;  %v704_v34 = vsel %vm646_vm13, %v702_v46, %v615_v0 }
 0x269   :  { %v617_v23 = vpop.permute.xlu1 %616 }
 0x26a   :  { %v645_v56 = vsel %vm643_vm12, %v642_v20, %v617_v23  ;;  %v705_v58 = vsel %vm646_vm13, %v703_v54, %v617_v23 }
 0x26b   :  { %v621_v31 = vpop.permute.xlu0 %620 }
 0x26c   :  { %v647_v22 = vsel %vm646_vm13, %v644_v51, %v621_v31  ;;  %v706_v52 = vsel %vm649_vm14, %v704_v34, %v621_v31 }
 0x26d   :  { %v650_v28 = vsel %vm649_vm14, %v647_v22, %v627_v18  ;;  %v716_v26 = vadd.f32 %v714_v36, %v706_v52  ;;  %v623_v32 = vpop.permute.xlu1 %622 }
 0x26e   :  { %v670_v44 = vadd.f32 %v668_v55, %v650_v28  ;;  %v648_v53 = vsel %vm646_vm13, %v645_v56, %v623_v32  ;;  %v707_v3 = vsel %vm649_vm14, %v705_v58, %v623_v32 }
 0x26f   :  { %v718_v59 = vadd.f32 %v716_v26, %v586_v29  ;;  %v651_v60 = vsel %vm649_vm14, %v648_v53, %v1347_v62  ;;  %v717_v16 = vadd.f32 %v715_v4, %v707_v3 }
 0x270   :  { %v672_v6 = vadd.f32 %v670_v44, %v586_v29  ;;  %v671_v7 = vadd.f32 %v669_v48, %v651_v60 }
 0x271   :  { %842 = vtanh.f32 %v718_v59  ;;  %v719_v8 = vadd.f32 %v717_v16, %v587_v30 }
 0x272   :  { %844 = vtanh.f32 %v672_v6  ;;  %v673_v5 = vadd.f32 %v671_v7, %v587_v30 }
 0x273   :  { %846 = vtanh.f32 %v719_v8 }
 0x274   :  { %848 = vtanh.f32 %v673_v5 }
 0x27b   :  { %v843_v18 = vpop.eup %842 }
 0x27c   :  { %v845_v10 = vpop.eup %844  ;;  %v773_v37 = vpack.c.bf16 %v843_v18, %v843_v18 }
 0x27d   :  { %v847_v35 = vpop.eup %846 }
 0x27e   :  { %v849_v40 = vpop.eup %848  ;;  %766 = vst [vmem:[%s1415_s9 + $0xc] sm:$0xf] %v773_v37  ;;  %v774_v21 = vpack.c.bf16 %v847_v35, %v847_v35 }
 0x27f   :  { %v778_v62 = vpack.c.bf16 %v849_v40, %v845_v10 }
 0x280   :  { %767 = vst [vmem:[%s1415_s9 + $0x10] sm:$0xf] %v774_v21 }
 0x281   :  { %779 = vst [vmem:[%s1415_s9] sm:$0xff] %v778_v62  }

</bundles_post_ra>
